<compile_context>
chip_gen: v5e
topology: v5e:2x2
jax: 0.10.0
libtpu: 0.0.40
codegen_flags: <defaults>
</compile_context>

<pallas_src>
import jax
import jax.numpy as jnp
from jax.experimental import pallas as pl
from jax.experimental.pallas import tpu as pltpu


def mlp_heads_kernel(x_ref, w1_ref, b1_ref, w2_ref, b2_ref, o_ref):
    """One batch tile of the fused multi-head MLP.

    x_ref:  (TB, F)            f32  -- features tile (cast to bf16 in-kernel)
    w1_ref: (F, out_dim*64)    bf16 -- all heads' first-layer weights, head-major cols
    b1_ref: (1, out_dim*64)    f32
    w2_ref: (out_dim*64, out_dim) bf16 -- block-diagonal second-layer weights
    b2_ref: (1, out_dim)       f32
    o_ref:  (TB, out_dim)      f32
    """
    # Stage 1: one wide MXU matmul for all heads (bf16 in, f32 accumulate).
    x = x_ref[...].astype(w1_ref.dtype)
    h = jnp.dot(x, w1_ref[...], preferred_element_type=jnp.float32)
    h = jnp.maximum(h + b1_ref[...], 0.0)                 # bias + ReLU (VPU, f32)

    # Stage 2: every head's Linear(64, 1) folded into ONE small block-diagonal
    # MXU matmul (out_dim*64, out_dim).  bf16 operands, f32 accumulation.
    o = jnp.dot(h.astype(w2_ref.dtype), w2_ref[...],
                preferred_element_type=jnp.float32)
    o_ref[...] = (o + b2_ref[...]).astype(o_ref.dtype)


def pack_mlp_params(w1_all, b1_all, w2_all, b2_all, param_dtype=jnp.bfloat16):
    """Pack per-head params into lane/MXU-friendly slabs. Call ONCE at init time.

    w1_all: (out_dim, F, 64), b1_all: (out_dim, 64)
    w2_all: (out_dim, 64, 1), b2_all: (out_dim, 1)
    """
    out_dim, F, H = w1_all.shape
    # First stage: (F, out_dim*H), head-major columns.
    w1_cat = jnp.transpose(w1_all, (1, 0, 2)).reshape(F, out_dim * H)
    w1_cat = w1_cat.astype(param_dtype)
    b1_cat = b1_all.reshape(1, out_dim * H).astype(jnp.float32)
    # Second stage: block-diagonal (out_dim*H, out_dim) so all heads' Linear(64,1)
    # collapse into one MXU matmul.
    eye = jnp.eye(out_dim, dtype=jnp.float32)                      # (out_dim, out_dim)
    w2_bd = w2_all[:, :, 0][:, :, None] * eye[:, None, :]          # (out_dim, H, out_dim)
    w2_bd = w2_bd.reshape(out_dim * H, out_dim).astype(param_dtype)
    b2_cat = b2_all.reshape(1, out_dim).astype(jnp.float32)
    return w1_cat, b1_cat, w2_bd, b2_cat


def _vmem_budget_bytes():
    """~80% of physical per-core VMEM (trace-time query; conservative fallback)."""
    try:
        cap = int(pltpu.get_tpu_info().vmem_capacity_bytes)
    except Exception:
        cap = 64 << 20  # be conservative if the query is unavailable
    return min(int(cap * 0.8), cap - (8 << 20))


def mlp_layer_forward(features, packed_params, *, block_b=8192):
    """features: (B, F) float32; packed_params from pack_mlp_params.
    Returns (B, out_dim) f32, same as torch.cat([head(features) ...], dim=1)."""
    w1_cat, b1_cat, w2_bd, b2_cat = packed_params
    B, F = features.shape
    OH = w1_cat.shape[1]                 # out_dim * 64
    out_dim = b2_cat.shape[1]
    xb = features.dtype.itemsize

    # --- Batch tile sizing (generation-aware) -------------------------------
    vmem_budget = _vmem_budget_bytes()
    # Per-row VMEM cost: double-buffered x/out tiles + ~2x (TB, OH) f32 hidden
    # temporaries + one bf16 copy of the hidden for the stage-2 matmul.
    per_row = 2 * F * xb + 2 * out_dim * 4 + 2 * OH * 4 + OH * 2
    # Resident weights (assume double-buffered) + small biases + compiler slack.
    fixed = 2 * (F * OH * 2 + OH * out_dim * 2 + (OH + out_dim) * 4) + (2 << 20)
    tb_budget = max((vmem_budget - fixed) // per_row, 8)
    tb_budget = (tb_budget // 8) * 8

    # Keep >= 2 grid steps when possible so ("parallel",) gives both v7x
    # TensorCores work; costs at most one extra ~0.35us step on v5e/v6e.
    half_b = (((B + 1) // 2) + 7) // 8 * 8
    TB = int(max(min(block_b, tb_budget, half_b), 8))
    if TB >= B:
        TB = B                           # single full-extent tile (legal block shape)
    grid = (pl.cdiv(B, TB),)

    # --- Scheduler hint ------------------------------------------------------
    cost = pl.CostEstimate(
        flops=2 * B * F * OH            # stage-1 matmul
              + 3 * B * OH              # bias + ReLU + cast
              + 2 * B * OH * out_dim    # stage-2 block-diagonal matmul
              + B * out_dim,            # output bias
        transcendentals=0,
        bytes_accessed=(features.size * xb
                        + w1_cat.size * 2 + w2_bd.size * 2
                        + (b1_cat.size + b2_cat.size) * 4
                        + B * out_dim * 4),
    )

    vmem_bytes = TB * per_row + fixed
    vmem_limit = int(min(max(vmem_bytes, 4 << 20), vmem_budget))

    out = pl.pallas_call(
        mlp_heads_kernel,
        out_shape=jax.ShapeDtypeStruct((B, out_dim), jnp.float32),
        grid=grid,
        in_specs=[
            pl.BlockSpec((TB, F), lambda i: (i, 0)),        # batch-tiled features (f32)
            pl.BlockSpec((F, OH), lambda i: (0, 0)),        # resident w1 (bf16)
            pl.BlockSpec((1, OH), lambda i: (0, 0)),        # resident b1
            pl.BlockSpec((OH, out_dim), lambda i: (0, 0)),  # resident block-diag w2 (bf16)
            pl.BlockSpec((1, out_dim), lambda i: (0, 0)),   # resident b2
        ],
        out_specs=pl.BlockSpec((TB, out_dim), lambda i: (i, 0)),
        compiler_params=pltpu.CompilerParams(
            dimension_semantics=("parallel",),              # batch shards across TCs (v7x)
            vmem_limit_bytes=vmem_limit,
        ),
        cost_estimate=cost,
    )(features, w1_cat, b1_cat, w2_bd, b2_cat)
    return out


def _ref_forward(features, w1_all, b1_all, w2_all, b2_all):
    """Pure-JAX f32 reference matching the PyTorch module semantics."""
    outs = []
    for h in range(w1_all.shape[0]):
        hid = jnp.maximum(features @ w1_all[h] + b1_all[h], 0.0)   # (B, 64)
        outs.append(hid @ w2_all[h] + b2_all[h])                   # (B, 1)
    return jnp.concatenate(outs, axis=1)                           # (B, out_dim)


if __name__ == "__main__":
    B = 8            # batch
    F = 32           # num_features (base_model.base_model.num_features)
    H = 64           # hidden size of each head (fixed by the module)
    OUT_DIM = 4      # out_dim

    key = jax.random.PRNGKey(0)
    k_x, k_w1, k_b1, k_w2, k_b2 = jax.random.split(key, 5)

    # deterministic synthetic "features" (stand-in for base_model(x) output)
    features = jax.random.normal(k_x, (B, F), dtype=jnp.float32)

    # deterministic parameter init (shapes of nn.Linear(F,64) / nn.Linear(64,1) per head)
    w1_all = jax.random.normal(k_w1, (OUT_DIM, F, H), dtype=jnp.float32) * 0.1
    b1_all = jax.random.normal(k_b1, (OUT_DIM, H), dtype=jnp.float32) * 0.1
    w2_all = jax.random.normal(k_w2, (OUT_DIM, H, 1), dtype=jnp.float32) * 0.1
    b2_all = jax.random.normal(k_b2, (OUT_DIM, 1), dtype=jnp.float32) * 0.1

    # Packing (transpose / block-diagonal build) happens ONCE here, at init time.
    packed = pack_mlp_params(w1_all, b1_all, w2_all, b2_all)

    fwd = jax.jit(mlp_layer_forward)
    out = jax.block_until_ready(fwd(features, packed))

    ref = _ref_forward(features, w1_all, b1_all, w2_all, b2_all)
    assert out.shape == (B, OUT_DIM), out.shape
    # bf16 weights / bf16 hidden into the MXU -> loosen tolerance vs f32 reference.
    assert jnp.allclose(out, ref, atol=2e-2, rtol=2e-2), (out, ref)

    print("KERNEL_OK")
</pallas_src>

<mosaic_0001>
module attributes {stable_mosaic.version = 11 : i64} {
  func.func @mlp_heads_kernel(%arg0: i32, %arg1: memref<8x32xf32, #tpu.memory_space<vmem>>, %arg2: memref<32x256xbf16, #tpu.memory_space<vmem>>, %arg3: memref<1x256xf32, #tpu.memory_space<vmem>>, %arg4: memref<256x4xbf16, #tpu.memory_space<vmem>>, %arg5: memref<1x4xf32, #tpu.memory_space<vmem>>, %arg6: memref<8x4xf32, #tpu.memory_space<vmem>>) attributes {dimension_semantics = [#tpu.dimension_semantics<parallel>], iteration_bounds = array<i64: 1>, scalar_prefetch = 0 : i64, scratch_operands = 0 : i64, tpu.core_type = #tpu.core_type<tc>, window_params = [{transform_indices = @transform_0, window_bounds = array<i64: 8, 32>}, {pipeline_mode = #tpu.pipeline_mode<synchronous>, transform_indices = @transform_1, window_bounds = array<i64: 32, 256>}, {pipeline_mode = #tpu.pipeline_mode<synchronous>, transform_indices = @transform_2, window_bounds = array<i64: 1, 256>}, {pipeline_mode = #tpu.pipeline_mode<synchronous>, transform_indices = @transform_3, window_bounds = array<i64: 256, 4>}, {pipeline_mode = #tpu.pipeline_mode<synchronous>, transform_indices = @transform_4, window_bounds = array<i64: 1, 4>}, {transform_indices = @transform_5, window_bounds = array<i64: 8, 4>}]} {
    %c0 = arith.constant 0 : index
    %c0_0 = arith.constant 0 : index
    %0 = vector.load %arg1[%c0, %c0_0] : memref<8x32xf32, #tpu.memory_space<vmem>>, vector<8x32xf32>
    %1 = arith.truncf %0 : vector<8x32xf32> to vector<8x32xbf16>
    %c0_1 = arith.constant 0 : index
    %c0_2 = arith.constant 0 : index
    %2 = vector.load %arg2[%c0_1, %c0_2] : memref<32x256xbf16, #tpu.memory_space<vmem>>, vector<32x256xbf16>
    %cst = arith.constant dense<0.000000e+00> : vector<8x256xf32>
    %3 = tpu.matmul %1, %2, %cst {dimension_numbers = #tpu.dot_dimension_numbers<[1], [0], [0], [1], [0, 0, 1, 1], [], []>} : vector<8x32xbf16>, vector<32x256xbf16>, vector<8x256xf32> -> vector<8x256xf32>
    %c0_3 = arith.constant 0 : index
    %c0_4 = arith.constant 0 : index
    %4 = vector.load %arg3[%c0_3, %c0_4] : memref<1x256xf32, #tpu.memory_space<vmem>>, vector<1x256xf32>
    %5 = vector.broadcast %4 : vector<1x256xf32> to vector<8x256xf32>
    %6 = arith.addf %3, %5 : vector<8x256xf32>
    %cst_5 = arith.constant 0.000000e+00 : f32
    %7 = vector.broadcast %cst_5 : f32 to vector<8x256xf32>
    %8 = arith.maximumf %6, %7 : vector<8x256xf32>
    %9 = arith.truncf %8 : vector<8x256xf32> to vector<8x256xbf16>
    %c0_6 = arith.constant 0 : index
    %c0_7 = arith.constant 0 : index
    %10 = vector.load %arg4[%c0_6, %c0_7] : memref<256x4xbf16, #tpu.memory_space<vmem>>, vector<256x4xbf16>
    %cst_8 = arith.constant dense<0.000000e+00> : vector<8x4xf32>
    %11 = tpu.matmul %9, %10, %cst_8 {dimension_numbers = #tpu.dot_dimension_numbers<[1], [0], [0], [1], [0, 0, 1, 1], [], []>} : vector<8x256xbf16>, vector<256x4xbf16>, vector<8x4xf32> -> vector<8x4xf32>
    %c0_9 = arith.constant 0 : index
    %c0_10 = arith.constant 0 : index
    %12 = vector.load %arg5[%c0_9, %c0_10] : memref<1x4xf32, #tpu.memory_space<vmem>>, vector<1x4xf32>
    %13 = vector.broadcast %12 : vector<1x4xf32> to vector<8x4xf32>
    %14 = arith.addf %11, %13 : vector<8x4xf32>
    %c0_11 = arith.constant 0 : index
    %c0_12 = arith.constant 0 : index
    %15 = vector.load %arg6[%c0_11, %c0_12] : memref<8x4xf32, #tpu.memory_space<vmem>>, vector<8x4xf32>
    tpu.vector_store %arg6[%c0_11, %c0_12], %14 {strides = array<i32>} : memref<8x4xf32, #tpu.memory_space<vmem>>, vector<8x4xf32>,
    return
  }
  func.func @transform_0(%arg0: i32) -> (i32, i32) {
    %c0_i32 = arith.constant 0 : i32
    %c0_i32_0 = arith.constant 0 : i32
    return %arg0, %c0_i32 : i32, i32
  }
  func.func @transform_1(%arg0: i32) -> (i32, i32) {
    %c0_i32 = arith.constant 0 : i32
    %c0_i32_0 = arith.constant 0 : i32
    %c0_i32_1 = arith.constant 0 : i32
    return %c0_i32, %c0_i32_0 : i32, i32
  }
  func.func @transform_2(%arg0: i32) -> (i32, i32) {
    %c0_i32 = arith.constant 0 : i32
    %c0_i32_0 = arith.constant 0 : i32
    %c0_i32_1 = arith.constant 0 : i32
    return %c0_i32, %c0_i32_0 : i32, i32
  }
  func.func @transform_3(%arg0: i32) -> (i32, i32) {
    %c0_i32 = arith.constant 0 : i32
    %c0_i32_0 = arith.constant 0 : i32
    %c0_i32_1 = arith.constant 0 : i32
    return %c0_i32, %c0_i32_0 : i32, i32
  }
  func.func @transform_4(%arg0: i32) -> (i32, i32) {
    %c0_i32 = arith.constant 0 : i32
    %c0_i32_0 = arith.constant 0 : i32
    %c0_i32_1 = arith.constant 0 : i32
    return %c0_i32, %c0_i32_0 : i32, i32
  }
  func.func @transform_5(%arg0: i32) -> (i32, i32) {
    %c0_i32 = arith.constant 0 : i32
    %c0_i32_0 = arith.constant 0 : i32
    return %arg0, %c0_i32 : i32, i32
  }
}

</mosaic_0001>

<bundles_post_ra>
// kernel: mlp_layer_forward.1
= control target key start
LH: loop header
LB: loop body
LE: loop exit
PB: predicated region body
PF: predicated region fallthrough
CT: control target
= control target key end

     0   :  { %vm53_vm0 = vcmask 261120   ;;  %vm245_vm1 = vcmask 31744   ;;  %s468_s1 = inlined_call_operand.vmem [shape: bf16[32,256], index: 1, kind: input, shape index: {}]   ;;  %s469_s0 = inlined_call_operand.vmem [shape: f32[8,32], index: 0, kind: input, shape index: {}]   ;;  %s470_s3 = inlined_call_operand.vmem [shape: bf16[256,4], index: 3, kind: input, shape index: {}]   ;;  %s471_s4 = inlined_call_operand.vmem [shape: f32[1,4], index: 4, kind: input, shape index: {}]   ;;  %s472_s2 = inlined_call_operand.vmem [shape: f32[1,256], index: 2, kind: input, shape index: {}]   ;;  %s473_s5 = inlined_call_operand.vmem [shape: f32[8,4], index: 5, kind: output, shape index: {}]  }
   0x1   :  { %v261_v0 = vld [vmem:[%s468_s1 + $0x10] sm:$0xf]  ;;  %v336_v1 = vld [vmem:[%s468_s1 + $0x14] sm:$0xf0]  ;;  %v335_v2 = vld [vmem:[%s468_s1 + $0x14] sm:$0xf] }
   0x2   :  { %v262_v3 = vor.u32 %v336_v1, %v261_v0  ;;  %v263_v4 = vld [vmem:[%s468_s1 + $0x18] sm:$0xf0]  ;;  %v253_v5 = vld [vmem:[%s468_s1] sm:$0xf]  ;;  %v334_v6 = vld [vmem:[%s468_s1 + $0x4] sm:$0xf0] }
   0x3   :  { %v266_v7 = vor.u32 %v335_v2, %v263_v4  ;;  %v333_v8 = vld [vmem:[%s468_s1 + $0x4] sm:$0xf]  ;;  %v255_v9 = vld [vmem:[%s468_s1 + $0x8] sm:$0xf0]  ;;  %v254_v10 = vor.u32 %v334_v6, %v253_v5  ;;  %v344_v12 = vld [vmem:[%s470_s3 + $0x38] sm:$0xff] }
   0x4   :  { %63 = vmatpush.bf16.msra.mxu0 %v262_v3  ;;  %v21_v11 = vld [vmem:[%s469_s0] sm:$0xff]  ;;  %v352_v13 = vld [vmem:[%s470_s3 + $0x78] sm:$0xff]  ;;  %v258_v14 = vor.u32 %v333_v8, %v255_v9  ;;  %219 = vmatpush.bf16.msra.mxu2 %v344_v12  ;;  %v343_v15 = vld [vmem:[%s470_s3 + $0x30] sm:$0xff] }
   0x5   :  { %76 = vmatpush.bf16.msra.mxu1 %v266_v7  ;;  %232 = vmatpush.bf16.msra.mxu3 %v352_v13  ;;  %v351_v16 = vld [vmem:[%s470_s3 + $0x70] sm:$0xff]  ;;  %v22_v17 = vpack.c.bf16 %v21_v11, %v21_v11  ;;  %v342_v18 = vld [vmem:[%s470_s3 + $0x28] sm:$0xff]  ;;  %v341_v20 = vld [vmem:[%s470_s3 + $0x20] sm:$0xff] }
   0x6   :  { %v350_v19 = vld [vmem:[%s470_s3 + $0x68] sm:$0xff]  ;;  %v349_v21 = vld [vmem:[%s470_s3 + $0x60] sm:$0xff]  ;;  %v340_v22 = vld [vmem:[%s470_s3 + $0x18] sm:$0xff] }
   0x7   :  { %v348_v23 = vld [vmem:[%s470_s3 + $0x58] sm:$0xff]  ;;  %v339_v24 = vld [vmem:[%s470_s3 + $0x10] sm:$0xff]  ;;  %v338_v26 = vld [vmem:[%s470_s3 + $0x8] sm:$0xff] }
   0x8   :  { %64 = vmatpush.bf16.msra.mxu0 %v254_v10  ;;  %220 = vmatpush.bf16.msra.mxu2 %v343_v15  ;;  %v347_v25 = vld [vmem:[%s470_s3 + $0x50] sm:$0xff]  ;;  %v346_v27 = vld [vmem:[%s470_s3 + $0x48] sm:$0xff]  ;;  %v337_v28 = vld [vmem:[%s470_s3] sm:$0xff] }
   0x9   :  { %77 = vmatpush.bf16.msra.mxu1 %v258_v14  ;;  %233 = vmatpush.bf16.msra.mxu3 %v351_v16  ;;  %v345_v29 = vld [vmem:[%s470_s3 + $0x40] sm:$0xff] }
   0xa   :  { %v27_v30 = vld [vmem:[%s472_s2] sm:$0x3] }
   0xb   :  { %267 = vmatmul.msk.bf16.vlgmr.msra.gmra.mxu0 %vm53_vm0, %v22_v17  ;;  %v29_v31 = vperm.slane %v27_v30, 0  ;;  %v30_v32 = vperm.slane %v27_v30, 1  ;;  %v353_v43 = vld [vmem:[%s471_s4] ss:$0 sm:$0xff] }
   0xc   :  { %268 = vmatmul.msk.bf16.vlgmr.msra.gmra.mxu1 %vm53_vm0, %v22_v17  ;;  %221 = vmatpush.bf16.msra.mxu2 %v342_v18 }
   0xd   :  { %234 = vmatpush.bf16.msra.mxu3 %v350_v19 }
  0x10   :  { %222 = vmatpush.bf16.msra.mxu2 %v341_v20 }
  0x11   :  { %235 = vmatpush.bf16.msra.mxu3 %v349_v21 }
  0x14   :  { %223 = vmatpush.bf16.msra.mxu2 %v340_v22 }
  0x15   :  { %236 = vmatpush.bf16.msra.mxu3 %v348_v23 }
  0x18   :  { %224 = vmatpush.bf16.msra.mxu2 %v339_v24 }
  0x19   :  { %237 = vmatpush.bf16.msra.mxu3 %v347_v25 }
  0x1c   :  { %225 = vmatpush.bf16.msra.mxu2 %v338_v26 }
  0x1d   :  { %238 = vmatpush.bf16.msra.mxu3 %v346_v27 }
  0x20   :  { %226 = vmatpush.bf16.msra.mxu2 %v337_v28 }
  0x21   :  { %239 = vmatpush.bf16.msra.mxu3 %v345_v29 }
  0x88   :  { %v66_v33 = vpop.f32.mrf.mxu0 }
  0x89   :  { %v67_v34 = vadd.f32 %v66_v33, %v29_v31  ;;  %v79_v35 = vpop.f32.mrf.mxu1 }
  0x8a   :  { %v80_v36 = vadd.f32 %v79_v35, %v30_v32 }
  0x8b   :  { %v83_v37 = vmax.f32 %v67_v34, 0.0 }
  0x8c   :  { %v84_v38 = vmax.f32 %v80_v36, 0.0 }
  0x8d   :  { %v85_v39 = vpack.c.bf16 %v83_v37, %v83_v37 }
  0x8e   :  { %v86_v40 = vpack.c.bf16 %v84_v38, %v84_v38 }
  0x8f   :  { %227 = vmatmul.bf16.vlgmr.msra.gmra.mxu2 %v85_v39 }
  0x90   :  { %240 = vmatmul.bf16.vlgmr.msra.gmra.mxu3 %v86_v40  ;;  %v68_v41 = vpop.f32.mrf.mxu0 }
  0x91   :  { %v81_v42 = vpop.f32.mrf.mxu1 }
 0x112   :  { %v228_v44 = vpop.f32.mrf.mxu2 }
 0x113   :  { %v229_v45 = vadd.f32 %v353_v43, %v228_v44  ;;  %v241_v46 = vpop.f32.mrf.mxu3 }
 0x115   :  { %v242_v47 = vadd.f32 %v241_v46, %v229_v45 }
 0x117   :  { %246 = vst.msk [vmem:[%s473_s5] sm:$0xff] %vm245_vm1, %v242_v47 }
 0x11a   :  { %v230_v48 = vpop.f32.mrf.mxu2 }
 0x11b   :  { %v243_v49 = vpop.f32.mrf.mxu3 }

</bundles_post_ra>
